<compile_context>
chip_gen: v7x
topology: tpu7x:2x2x1
jax: 0.10.0
libtpu: 0.0.40
codegen_flags: <defaults>
</compile_context>

<pallas_src>
import math

import jax
import jax.numpy as jnp
from jax import lax
from jax.experimental import pallas as pl
from jax.experimental.pallas import tpu as pltpu


def _round_up(x, m):
    return ((x + m - 1) // m) * m


def _cdiv(a, b):
    return -(-a // b)


def _sublane(dtype):
    # Packed sublane tiling: f32 -> 8 rows/vreg, bf16 -> 16, int8/fp8 -> 32.
    return max(8, 32 // jnp.dtype(dtype).itemsize)


def _vmem_block_bytes(rows, cols, dtype):
    """Bytes one VMEM block really occupies (sublane/lane padding included)."""
    it = jnp.dtype(dtype).itemsize
    return _round_up(max(rows, 1), _sublane(dtype)) * _round_up(max(cols, 1), 128) * it


def _vmem_capacity_bytes():
    try:
        info = pltpu.get_tpu_info()
        cap = getattr(info, "vmem_capacity_bytes", None)
        if cap:
            return int(cap)
    except Exception:
        pass
    return 64 * 1024 * 1024  # conservative fallback (v7x per-core VMEM)


def _choose_tile_m(m, per_row_bytes, sublane, vmem_cap):
    """Largest M tile whose double-buffered x/out blocks fit the tile budget."""
    budget = max(16 * 1024 * 1024, int(0.35 * vmem_cap))   # ~44 MiB v5e/v6e, ~22 MiB v7x
    max_tile = 2048 if vmem_cap >= 96 * 1024 * 1024 else 1024
    t = budget // max(2 * per_row_bytes, 1)
    t = max(t, sublane)
    t = min(t, max_tile, _round_up(m, sublane))
    if t >= 128:
        t = (t // 128) * 128
    else:
        t = max(sublane, (t // sublane) * sublane)
    # Keep at least 2 grid steps for moderate/large M (megacore on v7x).
    if m >= 256:
        t = min(t, _round_up(_cdiv(m, 2), 128))
    return t


def _lora_kernel(x_ref, a_ref, bt_ref, o_ref):
    # x_ref:  (TM, in_features)
    # a_ref:  (rank, in_features)   -- lane-dense A (no transpose in HBM/VMEM)
    # bt_ref: (rank, out_features)  -- scale already folded in
    # o_ref:  (TM, out_features)
    x = x_ref[...]
    if x.dtype != a_ref.dtype:
        x = x.astype(a_ref.dtype)           # in-kernel cast (no wrapper HBM pass)
    # x @ A.T: contract the last dims of both operands (A stays lane-dense).
    xa = lax.dot_general(
        x, a_ref[...],
        dimension_numbers=(((1,), (1,)), ((), ())),
        preferred_element_type=jnp.float32)                       # (TM, rank) f32
    # Second matmul has K = rank (tiny): keep xa in f32, up-cast the tiny B.T.
    out = jnp.dot(xa, bt_ref[...].astype(jnp.float32),
                  preferred_element_type=jnp.float32)             # (TM, N) f32
    o_ref[...] = out.astype(o_ref.dtype)


def lora_forward(x, lora_A, lora_B, alpha=1, rank=4, compute_dtype=None):
    """Pallas LoRA forward. x: [..., in_features] -> [..., out_features]."""
    assert rank > 0
    in_features = x.shape[-1]
    out_features = lora_B.shape[0]
    assert lora_A.shape == (rank, in_features)
    assert lora_B.shape == (out_features, rank)
    scale = alpha / rank

    cdt = jnp.dtype(compute_dtype) if compute_dtype is not None else jnp.dtype(x.dtype)
    out_dtype = x.dtype

    lead_shape = x.shape[:-1]
    m = int(math.prod(lead_shape)) if lead_shape else 1
    # No wrapper astype of x (would be an extra full HBM read+write).
    x2d = x.reshape(m, in_features)

    # A stays (rank, in_features) lane-dense; scale is folded into the tiny B.T.
    a = lora_A.astype(cdt)
    bt = (scale * lora_B.astype(jnp.float32).T).astype(cdt)       # (rank, out)

    x_it = jnp.dtype(x.dtype).itemsize
    o_it = jnp.dtype(out_dtype).itemsize
    sublane = max(_sublane(x.dtype), _sublane(out_dtype))

    vmem_cap = _vmem_capacity_bytes()
    per_row = (_round_up(in_features, 128) * x_it
               + _round_up(out_features, 128) * o_it)
    tile_m = _choose_tile_m(m, per_row, sublane, vmem_cap)
    grid = (_cdiv(m, tile_m),)

    # Honest VMEM estimate: double-buffered x/out blocks + double-buffered
    # (tiny, lane-dense) weights, all with sublane/lane padding included.
    vmem_bytes = (
        2 * (_vmem_block_bytes(tile_m, in_features, x.dtype)
             + _vmem_block_bytes(tile_m, out_features, out_dtype))
        + 2 * (_vmem_block_bytes(rank, in_features, cdt)
               + _vmem_block_bytes(rank, out_features, cdt)))
    vmem_limit = int(min(int(0.75 * vmem_cap),
                         max(16 * 1024 * 1024, vmem_bytes + 4 * 1024 * 1024)))

    flops = 2 * m * in_features * rank + 2 * m * rank * out_features
    bytes_accessed = (m * in_features * x_it + m * out_features * o_it
                      + (a.size + bt.size) * jnp.dtype(cdt).itemsize)
    cost = pl.CostEstimate(flops=flops, transcendentals=0,
                           bytes_accessed=bytes_accessed)

    out2d = pl.pallas_call(
        _lora_kernel,
        out_shape=jax.ShapeDtypeStruct((m, out_features), out_dtype),
        grid_spec=pltpu.PrefetchScalarGridSpec(
            num_scalar_prefetch=0,
            grid=grid,
            in_specs=[
                pl.BlockSpec((tile_m, in_features), lambda i: (i, 0)),
                pl.BlockSpec((rank, in_features), lambda i: (0, 0)),
                pl.BlockSpec((rank, out_features), lambda i: (0, 0)),
            ],
            out_specs=pl.BlockSpec((tile_m, out_features), lambda i: (i, 0)),
        ),
        compiler_params=pltpu.CompilerParams(
            dimension_semantics=("parallel",),
            vmem_limit_bytes=vmem_limit,
        ),
        cost_estimate=cost,
    )(x2d, a, bt)

    return out2d.reshape(*lead_shape, out_features)


def init_lora_params(key, in_features, out_features, rank):
    """Deterministic init matching the PyTorch module:
    A <- kaiming_uniform_(a=sqrt(5))  => U(-1/sqrt(fan_in), 1/sqrt(fan_in))
    B <- zeros
    """
    bound = 1.0 / math.sqrt(in_features)
    lora_A = jax.random.uniform(
        key, (rank, in_features), jnp.float32, minval=-bound, maxval=bound
    )
    lora_B = jnp.zeros((out_features, rank), jnp.float32)
    return lora_A, lora_B


if __name__ == "__main__":
    key = jax.random.PRNGKey(0)
    k_x, k_a, k_b = jax.random.split(key, 3)

    batch, seq, in_features, out_features, rank, alpha = 2, 8, 32, 64, 4, 1

    x = jax.random.normal(k_x, (batch, seq, in_features), jnp.float32)
    lora_A, lora_B = init_lora_params(k_a, in_features, out_features, rank)

    # Module-faithful init (B == 0 -> correction is exactly zero).
    out = lora_forward(x, lora_A, lora_B, alpha=alpha, rank=rank)
    out = jax.block_until_ready(out)
    ref = (alpha / rank) * ((x @ lora_A.T) @ lora_B.T)
    assert out.shape == (batch, seq, out_features)
    assert jnp.allclose(out, ref, atol=1e-5, rtol=1e-5)

    # Exercise the full matmul chain numerically with a nonzero B.
    lora_B_nz = 0.1 * jax.random.normal(k_b, (out_features, rank), jnp.float32)
    out_nz = jax.block_until_ready(
        lora_forward(x, lora_A, lora_B_nz, alpha=alpha, rank=rank)
    )
    ref_nz = (alpha / rank) * ((x @ lora_A.T) @ lora_B_nz.T)
    assert jnp.allclose(out_nz, ref_nz, atol=1e-4, rtol=1e-4)

    # Ragged-M case (M = 111, not a multiple of 8) exercises masked edge blocks.
    x_big = jax.random.normal(k_x, (3, 37, in_features), jnp.float32)
    out_big = jax.block_until_ready(
        lora_forward(x_big, lora_A, lora_B_nz, alpha=alpha, rank=rank)
    )
    ref_big = (alpha / rank) * ((x_big @ lora_A.T) @ lora_B_nz.T)
    assert out_big.shape == (3, 37, out_features)
    assert jnp.allclose(out_big, ref_big, atol=1e-4, rtol=1e-4)

    print("KERNEL_OK")
</pallas_src>

<mosaic_0001>
module attributes {stable_mosaic.version = 11 : i64} {
  func.func @_lora_kernel(%arg0: i32, %arg1: memref<16x32xf32, #tpu.memory_space<vmem>>, %arg2: memref<4x32xf32, #tpu.memory_space<vmem>>, %arg3: memref<4x64xf32, #tpu.memory_space<vmem>>, %arg4: memref<16x64xf32, #tpu.memory_space<vmem>>) attributes {dimension_semantics = [#tpu.dimension_semantics<parallel>], iteration_bounds = array<i64: 1>, scalar_prefetch = 0 : i64, scratch_operands = 0 : i64, tpu.core_type = #tpu.core_type<tc>, window_params = [{transform_indices = @transform_0, window_bounds = array<i64: 16, 32>}, {pipeline_mode = #tpu.pipeline_mode<synchronous>, transform_indices = @transform_1, window_bounds = array<i64: 4, 32>}, {pipeline_mode = #tpu.pipeline_mode<synchronous>, transform_indices = @transform_2, window_bounds = array<i64: 4, 64>}, {transform_indices = @transform_3, window_bounds = array<i64: 16, 64>}]} {
    %c0 = arith.constant 0 : index
    %c0_0 = arith.constant 0 : index
    %0 = vector.load %arg1[%c0, %c0_0] : memref<16x32xf32, #tpu.memory_space<vmem>>, vector<16x32xf32>
    %c0_1 = arith.constant 0 : index
    %c0_2 = arith.constant 0 : index
    %1 = vector.load %arg2[%c0_1, %c0_2] : memref<4x32xf32, #tpu.memory_space<vmem>>, vector<4x32xf32>
    %cst = arith.constant dense<0.000000e+00> : vector<16x4xf32>
    %2 = tpu.matmul %0, %1, %cst {dimension_numbers = #tpu.dot_dimension_numbers<[1], [1], [0], [0], [0, 0, 1, 0], [], []>} : vector<16x32xf32>, vector<4x32xf32>, vector<16x4xf32> -> vector<16x4xf32>
    %c0_3 = arith.constant 0 : index
    %c0_4 = arith.constant 0 : index
    %3 = vector.load %arg3[%c0_3, %c0_4] : memref<4x64xf32, #tpu.memory_space<vmem>>, vector<4x64xf32>
    %cst_5 = arith.constant dense<0.000000e+00> : vector<16x64xf32>
    %4 = tpu.matmul %2, %3, %cst_5 {dimension_numbers = #tpu.dot_dimension_numbers<[1], [0], [0], [1], [0, 0, 1, 1], [], []>} : vector<16x4xf32>, vector<4x64xf32>, vector<16x64xf32> -> vector<16x64xf32>
    %c0_6 = arith.constant 0 : index
    %c0_7 = arith.constant 0 : index
    %5 = vector.load %arg4[%c0_6, %c0_7] : memref<16x64xf32, #tpu.memory_space<vmem>>, vector<16x64xf32>
    tpu.vector_store %arg4[%c0_6, %c0_7], %4 {strides = array<i32>} : memref<16x64xf32, #tpu.memory_space<vmem>>, vector<16x64xf32>,
    return
  }
  func.func @transform_0(%arg0: i32) -> (i32, i32) {
    %c0_i32 = arith.constant 0 : i32
    %c0_i32_0 = arith.constant 0 : i32
    return %arg0, %c0_i32 : i32, i32
  }
  func.func @transform_1(%arg0: i32) -> (i32, i32) {
    %c0_i32 = arith.constant 0 : i32
    %c0_i32_0 = arith.constant 0 : i32
    %c0_i32_1 = arith.constant 0 : i32
    return %c0_i32, %c0_i32_0 : i32, i32
  }
  func.func @transform_2(%arg0: i32) -> (i32, i32) {
    %c0_i32 = arith.constant 0 : i32
    %c0_i32_0 = arith.constant 0 : i32
    %c0_i32_1 = arith.constant 0 : i32
    return %c0_i32, %c0_i32_0 : i32, i32
  }
  func.func @transform_3(%arg0: i32) -> (i32, i32) {
    %c0_i32 = arith.constant 0 : i32
    %c0_i32_0 = arith.constant 0 : i32
    return %arg0, %c0_i32 : i32, i32
  }
}

</mosaic_0001>

<bundles_post_ra>
// kernel: tpu_custom_call.1
= control target key start
LH: loop header
LB: loop body
LE: loop exit
PB: predicated region body
PF: predicated region fallthrough
CT: control target
= control target key end

     0   :  { %8 = vsyncpa [#allocation3], 0  ;;  %s406_s0 = inlined_call_operand.hbm [shape: f32[16,32], index: 0, kind: input, shape index: {}]   ;;  %s407_s1 = inlined_call_operand.hbm [shape: f32[4,32], index: 1, kind: input, shape index: {}]   ;;  %s408_s2 = inlined_call_operand.vmem [shape: f32[4,64], index: 2, kind: input, shape index: {}]   ;;  %s409_s3 = inlined_call_operand.hbm [shape: f32[16,64], index: 3, kind: output, shape index: {}]  }
   0x1   :  { %9 = vsyncpa [#allocation6], 0 }
   0x2   :  { %10 = vsyncpa [#allocation4], 0  ;;  %s336_s12 = smov [#allocation2]   ;;  %s264_s16 = scalar_lea.hbm %s406_s0, 256 }
   0x3   :  { %s16_s13 = sshll.u32 %s336_s12, 4  ;;  %p265_p0 = scmp.ne.s32.totalorder %s406_s0, %s264_s16  ;;  %s17_s13 = int_to_ptr.vmem [resolvable:$true] %s16_s13 }
   0x4   :  { %p268_p1 = scmp.lt.u32.totalorder %s264_s16, %s406_s0 }
   0x6   :  { %p270_p2 = pnand %p268_p1, %p265_p0 }
   0x8   :  { %273 = shalt.err (!%p270_p2)
}
   0x9   :  { %s274_s21 = scalar_lea.vmem %s17_s13, 256  ;;  %p279_p4 = scmp.lt.s32.totalorder %s17_s13, %s17_s13 }
   0xa   :  { %p275_p3 = scmp.ne.s32.totalorder %s17_s13, %s274_s21  ;;  %p280_p5 = scmp.lt.s32.totalorder %s274_s21, %s274_s21 }
   0xc   :  { %p281_p6 = por %p280_p5, %p279_p4 }
   0xe   :  { %p282_p7 = pnand %p281_p6, %p275_p3 }
  0x10   :  { %285 = shalt.err (!%p282_p7)
}
  0x11   :  { %s337_s22 = smov 128   ;;  %s338_s23 = smov 8  }
  0x12   :  { %22 = dma.hbm_to_vmem [thread:$0]  %s406_s0, 256, %s17_s13, [#allocation3], %s337_s22, %s337_s22, %s338_s23  }
  0x13   :  { %s339_s26 = smov [#allocation5]   ;;  %s286_s30 = scalar_lea.hbm %s407_s1, 64 }
  0x14   :  { %s29_s27 = sshll.u32 %s339_s26, 4  ;;  %p287_p8 = scmp.ne.s32.totalorder %s407_s1, %s286_s30  ;;  %s30_s27 = int_to_ptr.vmem [resolvable:$true] %s29_s27 }
  0x15   :  { %p290_p9 = scmp.lt.u32.totalorder %s286_s30, %s407_s1 }
  0x17   :  { %p292_p10 = pnand %p290_p9, %p287_p8 }
  0x19   :  { %295 = shalt.err (!%p292_p10)
}
  0x1a   :  { %s296_s8 = scalar_lea.vmem %s30_s27, 64  ;;  %p301_p12 = scmp.lt.s32.totalorder %s30_s27, %s30_s27 }
  0x1b   :  { %p297_p11 = scmp.ne.s32.totalorder %s30_s27, %s296_s8  ;;  %p302_p13 = scmp.lt.s32.totalorder %s296_s8, %s296_s8 }
  0x1d   :  { %p303_p0 = por %p302_p13, %p301_p12 }
  0x1f   :  { %p304_p1 = pnand %p303_p0, %p297_p11 }
  0x21   :  { %307 = shalt.err (!%p304_p1)
}
  0x22   :  { %32 = dma.hbm_to_vmem [thread:$0]  %s407_s1, 64, %s30_s27, [#allocation6]  }
  0x23   :  { %330 = dma.done.wait [#allocation3], 256  }
  0x24   :  { %331 = vsyncadd [#allocation3], 4294967040 }
  0x25   :  { %332 = dma.done.wait [#allocation6], 64  }
  0x26   :  { %333 = vsyncadd [#allocation6], 4294967232  ;;  %vm44_vm0 = vcmask 261120   ;;  %v43_v0 = vld [vmem:[#allocation5] sm:$0xf]  ;;  %v41_v1 = vld [vmem:[#allocation2] sm:$0xff] }
  0x27   :  { %249 = vmatprep.subr.msk.mxu0 %vm44_vm0, %v43_v0  ;;  %251 = vmatprep.mubr.msk.f32.mxu0 %vm44_vm0, %v41_v1  ;;  %v42_v2 = vld [vmem:[#allocation2 + $0x8] sm:$0xff]  ;;  %v129_v3 = vld [vmem:[%s408_s2] sm:$0xf]  ;;  %vm137_vm1 = vcmask 1043456   ;;  %vm130_vm2 = vcmask 31744   ;;  %s340_s1 = smov [#allocation7]  }
  0x28   :  { %250 = vmatpush3.xpose.msk.msra.mxu0 %vm44_vm0, %v43_v0  ;;  %254 = vmatprep.subr.msk.mxu1 %vm137_vm1, %v129_v3  ;;  %s224_s12 = sshll.u32 %s340_s1, 4  ;;  %vm216_vm3 = vcmask 523264   ;;  %s225_s12 = int_to_ptr.vmem [resolvable:$true] %s224_s12 }
  0x29   :  { %255 = vmatpush3.msk.msra.mxu1 %vm137_vm1, %v129_v3  ;;  %s308_s13 = scalar_lea.vmem %s225_s12, 256  ;;  %p313_p3 = scmp.lt.s32.totalorder %s225_s12, %s225_s12 }
  0x2a   :  { %p309_p2 = scmp.ne.s32.totalorder %s225_s12, %s308_s13  ;;  %p314_p4 = scmp.lt.s32.totalorder %s308_s13, %s308_s13 }
  0x2b   :  { %252 = vmatmul.mubr.msk.f32.vlgmr.msra.gmra.mrb[0].mxu0 %vm44_vm0, %v42_v2 }
  0x2c   :  { %p315_p5 = por %p314_p4, %p313_p3 }
  0x2e   :  { %p316_p6 = pnand %p315_p5, %p309_p2 }
  0xfe   :  { %v253_v4 = vpop.f32.mrb[0].mxu0 }
  0xff   :  { %v120_v5 = vpop.f32.mrb[1].mxu0 }
 0x100   :  { %256 = vmatprep.mubr.msk.f32.mxu1 %vm130_vm2, %v120_v5 }
 0x101   :  { %257 = vmatmul.mubr.msk.f32.vlgmr.msra.gmra.mrb[0].mxu1 %vm130_vm2, %v253_v4 }
 0x1d4   :  { %v258_v6 = vpop.f32.mrb[0].mxu1 }
 0x1d5   :  { %218 = vst.msk [vmem:[#allocation7 + $0x8] sm:$0xff] %vm216_vm3, %v258_v6  ;;  %v207_v7 = vpop.f32.mrb[1].mxu1 }
 0x1d6   :  { %217 = vst.msk [vmem:[#allocation7] sm:$0xff] %vm216_vm3, %v207_v7 }
 0x1d7   :  { %319 = shalt.err (!%p316_p6)
}
 0x1d8   :  { %s320_s15 = scalar_lea.hbm %s409_s3, 256 }
 0x1d9   :  { %p321_p7 = scmp.ne.s32.totalorder %s409_s3, %s320_s15  ;;  %p324_p8 = scmp.lt.u32.totalorder %s320_s15, %s409_s3 }
 0x1db   :  { %p326_p9 = pnand %p324_p8, %p321_p7 }
 0x1dd   :  { %329 = shalt.err (!%p326_p9)
}
 0x1de   :  { %230 = dma.vmem_to_hbm [thread:$0]  %s225_s12, 256, %s409_s3, [#allocation4], %s337_s22, %s337_s22, %s338_s23  }
 0x1df   :  { %334 = dma.done.wait [#allocation4], 256  }
 0x1e0   :  { %335 = vsyncadd [#allocation4], 4294967040 }
 0x1e1   :  { %234 = vsyncpa [#allocation3], 1 }
 0x1e2   :  { %235 = vsyncpa [#allocation6], 1 }
 0x1e3   :  { %236 = vsyncpa [#allocation4], 1 }

</bundles_post_ra>
